<compile_context>
chip_gen: v7x
topology: tpu7x:2x2x1
jax: 0.10.0
libtpu: 0.0.40
codegen_flags: <defaults>
</compile_context>

<pallas_src>
import jax
import jax.numpy as jnp
from jax.experimental import pallas as pl
from jax.experimental.pallas import tpu as pltpu

# ----------------------------- model constants -----------------------------
N_FEATURES = 16          # self.N_features
N_HEADS = 8              # self.N_heads
AT_CHANNELS = 4          # at_channels (per-head out channels)
HIDDEN = AT_CHANNELS * N_HEADS   # 32
SPEC_VEC_LEN = 50000
NEG_SLOPE = 0.2          # GATv2Conv default negative_slope
N_LAYERS = 10
TN = 8192                # lane tile for the 50000-wide final linear
TM_MAX = 128             # target-row tile upper bound (shrunk by VMEM budget)
MASK_NEG = -1e30         # additive softmax mask for non-edges


def _round_up(a, b):
    return ((a + b - 1) // b) * b


def _tpu_vmem_bytes():
    try:
        info = pltpu.get_tpu_info()
        return int(getattr(info, "vmem_capacity_bytes", 128 * 1024 * 1024))
    except Exception:
        return 128 * 1024 * 1024


def _score_dtype():
    """bf16 score math on chips with native bf16 VPU (v6e+); f32 otherwise."""
    try:
        kind = jax.devices()[0].device_kind.lower()
    except Exception:
        return jnp.float32
    if any(v in kind for v in ("v2", "v3", "v4", "v5")):
        return jnp.float32
    return jnp.bfloat16


_VMEM_BYTES = _tpu_vmem_bytes()
# 96 MiB on 128 MiB parts (v5e/v6e), 48 MiB on 64 MiB parts (v7x).
GAT_VMEM_LIMIT = int(min(100 * 1024 * 1024, (_VMEM_BYTES * 3) // 4))
SCORE_DT = _score_dtype()
_ESZ = 2 if SCORE_DT == jnp.bfloat16 else 4


def _choose_tm(np_):
    """Pick the target-row tile from the actual VMEM budget (not a fixed 64)."""
    # per grid step: double-buffered bf16 mbias/e0/e1 tiles + [TM,8,Np] score
    # temporaries (+slack) + f32 softmax/alpha temporaries.
    per_row = np_ * (3 * 2 * 2 + 10 * _ESZ + 6 * 4)
    resident = np_ * HIDDEN * (_ESZ + 2 + 4)          # xlT + xl_agg + slack
    budget = max(int(GAT_VMEM_LIMIT * 0.7) - resident, 2 << 20)
    tm = TM_MAX
    while tm > 8 and tm * per_row > budget:
        tm //= 2
    return tm


def _node_tiling(n):
    n_pad = max(128, _round_up(n, 128))   # lane-aligned Np
    return n_pad, _choose_tm(n_pad)


# ============================ Pallas kernels ================================
def lin_l_kernel(x_ref, wl_ref, bl_ref, xlt_ref, xla_ref):
    """Hoisted GATv2 lin_l projection over ALL nodes (once per layer).

    Emits a lane-dense transposed copy (for the score broadcast) and a bf16
    copy (aggregation matmul rhs) so the row-tile kernel never recomputes them.
    """
    xl = jnp.dot(x_ref[...], wl_ref[...],
                 preferred_element_type=jnp.float32) + bl_ref[...]
    xlt_ref[...] = xl.T.astype(SCORE_DT)          # [HC, Np]
    xla_ref[...] = xl.astype(jnp.bfloat16)        # [Np, HC]


def gat_layer_kernel(x_ref, mb_ref, e0_ref, e1_ref, xlt_ref, xla_ref,
                     wrl_ref, brl_ref, we_ref, att_ref, bat_ref, out_ref):
    """One GATv2Conv row-tile (TM target rows) + parallel Linear + ELU.

    x_ref   : [TM, Fin]  this tile's target nodes
    mb_ref  : [TM, Np]   bf16 additive softmax mask (0 on edges, -1e30 else)
    e0/e1   : [TM, Np]   bf16 raw edge attributes (lin_edge applied in-kernel)
    xlt_ref : [HC, Np]   hoisted lin_l(x)^T           (SCORE_DT)
    xla_ref : [Np, HC]   hoisted lin_l(x)             (bf16, aggregation rhs)
    wrl/brl : [Fin,2HC]  fused [lin_r | parallel nn.Linear] weights/biases
    we      : [2, HC]    lin_edge weight (bias-free in GATv2Conv)
    att     : [1, HC]    per-head attention vectors (head-major flatten)
    bat     : [1, HC]    GATv2Conv output bias
    out_ref : [TM, HC]
    """
    # target-side lin_r and the parallel nn.Linear fused into one matmul
    xrl = jnp.dot(x_ref[...], wrl_ref[...],
                  preferred_element_type=jnp.float32) + brl_ref[...]
    xr = xrl[:, :HIDDEN].astype(SCORE_DT)           # [TM, HC]
    lin = xrl[:, HIDDEN:]                           # [TM, HC] f32

    mbias = mb_ref[...].astype(jnp.float32)         # [TM, Np] additive mask
    e0 = e0_ref[...].astype(SCORE_DT)[:, None, :]   # [TM, 1, Np]
    e1 = e1_ref[...].astype(SCORE_DT)[:, None, :]

    xlt = xlt_ref[...]                              # [HC, Np] (SCORE_DT)
    xla = xla_ref[...]                              # [Np, HC] bf16
    we = we_ref[...].astype(SCORE_DT)               # [2, HC]
    att = att_ref[...].astype(SCORE_DT)             # [1, HC]

    heads_out = []
    for p in range(N_HEADS // 2):                   # two heads per iteration
        c0 = p * 2 * AT_CHANNELS
        c1 = c0 + 2 * AT_CHANNELS
        xr_p = xr[:, c0:c1][:, :, None]             # [TM, 8, 1]
        xl_p = xlt[c0:c1, :][None, :, :]            # [1,  8, Np]
        we0 = we[0:1, c0:c1][:, :, None]            # [1,  8, 1]
        we1 = we[1:2, c0:c1][:, :, None]
        att_p = att[:, c0:c1][:, :, None]           # [1,  8, 1]

        # t[i,c,j] = lin_r(x_i) + lin_l(x_j) + lin_edge(e_ij)   (2 heads)
        t = xr_p + xl_p + e0 * we0 + e1 * we1       # [TM, 8, Np]
        t = jnp.maximum(t, NEG_SLOPE * t)           # leaky_relu (max form)
        u = t * att_p

        for k in range(2):                          # the two heads of the pair
            h = 2 * p + k
            s = jnp.sum(u[:, k * AT_CHANNELS:(k + 1) * AT_CHANNELS, :],
                        axis=1).astype(jnp.float32)            # [TM, Np]
            # masked softmax over source nodes j (additive mask; masked entries
            # underflow to exactly 0 after exp, denom >= 1 from the row max)
            s = s + mbias
            s = s - jnp.max(s, axis=1, keepdims=True)
            pexp = jnp.exp(s)
            denom = jnp.sum(pexp, axis=1, keepdims=True)
            alpha = (pexp * pl.reciprocal(denom, approx=True)
                     ).astype(jnp.bfloat16)                    # [TM, Np]
            # aggregation on the MXU: alpha_h [TM,Np] @ lin_l(x)_h [Np,C] (bf16)
            heads_out.append(
                jnp.dot(alpha, xla[:, h * AT_CHANNELS:(h + 1) * AT_CHANNELS],
                        preferred_element_type=jnp.float32))   # [TM, 4]

    # concat of tiny [TM,4] pieces is negligible vs. the [TM,8,Np] score chain
    gat = jnp.concatenate(heads_out, axis=1) + bat_ref[...]    # [TM, HC]
    y = gat + lin
    # ELU; exp only evaluated on the non-positive branch (no spurious inf)
    out_ref[...] = jnp.where(y > 0.0, y, jnp.exp(jnp.minimum(y, 0.0)) - 1.0)


def pool_kernel(pool_ref, x_ref, out_ref):
    """global_mean_pool as a [Gp, Np] @ [Np, HC] matmul (computed once)."""
    out_ref[...] = jnp.dot(pool_ref[...], x_ref[...],
                           preferred_element_type=jnp.float32)


def final_lin_kernel(x_ref, w_ref, b_ref, out_ref):
    """One TN-wide lane tile of the final Linear(HC -> 50000), bf16 weights."""
    out_ref[...] = jnp.dot(x_ref[...].astype(jnp.bfloat16), w_ref[...],
                           preferred_element_type=jnp.float32) + b_ref[...]


# ============================ kernel wrappers ===============================
def lin_l_project(x_pad, wl, bl):
    np_, fin = x_pad.shape
    vm = pl.BlockSpec(memory_space=pltpu.MemorySpace.VMEM)
    return pl.pallas_call(
        lin_l_kernel,
        out_shape=(jax.ShapeDtypeStruct((HIDDEN, np_), SCORE_DT),
                   jax.ShapeDtypeStruct((np_, HIDDEN), jnp.bfloat16)),
        in_specs=[vm, vm, vm],
        out_specs=(vm, vm),
    )(x_pad, wl, bl)


def gat_layer(x_pad, mbias, e0, e1, xlt, xla, lp, tm):
    np_, fin = x_pad.shape
    grid = (np_ // tm,)
    return pl.pallas_call(
        gat_layer_kernel,
        out_shape=jax.ShapeDtypeStruct((np_, HIDDEN), jnp.float32),
        grid=grid,
        in_specs=[
            pl.BlockSpec((tm, fin), lambda i: (i, 0)),           # x (target tile)
            pl.BlockSpec((tm, np_), lambda i: (i, 0)),           # mask bias tile
            pl.BlockSpec((tm, np_), lambda i: (i, 0)),           # edge attr 0
            pl.BlockSpec((tm, np_), lambda i: (i, 0)),           # edge attr 1
            pl.BlockSpec((HIDDEN, np_), lambda i: (0, 0)),       # lin_l(x)^T (resident)
            pl.BlockSpec((np_, HIDDEN), lambda i: (0, 0)),       # lin_l(x) bf16 (resident)
            pl.BlockSpec((fin, 2 * HIDDEN), lambda i: (0, 0)),   # [wr | wlin]
            pl.BlockSpec((1, 2 * HIDDEN), lambda i: (0, 0)),     # [br | blin]
            pl.BlockSpec((2, HIDDEN), lambda i: (0, 0)),         # we (lin_edge)
            pl.BlockSpec((1, HIDDEN), lambda i: (0, 0)),         # att
            pl.BlockSpec((1, HIDDEN), lambda i: (0, 0)),         # GAT bias
        ],
        out_specs=pl.BlockSpec((tm, HIDDEN), lambda i: (i, 0)),
        compiler_params=pltpu.CompilerParams(
            dimension_semantics=("parallel",),
            vmem_limit_bytes=GAT_VMEM_LIMIT,
        ),
    )(x_pad, mbias, e0, e1, xlt, xla,
      lp["w_rl"], lp["b_rl"], lp["we"], lp["att"], lp["bat"])


def global_mean_pool(x10_pad, pool_mat):
    gp = pool_mat.shape[0]
    hc = x10_pad.shape[1]
    vm = pl.BlockSpec(memory_space=pltpu.MemorySpace.VMEM)
    return pl.pallas_call(
        pool_kernel,
        out_shape=jax.ShapeDtypeStruct((gp, hc), jnp.float32),
        in_specs=[vm, vm],
        out_specs=vm,
    )(pool_mat, x10_pad)


def final_linear(x11, w_fin, b_fin):
    gp, hc = x11.shape
    vp = w_fin.shape[1]
    nb = vp // TN
    return pl.pallas_call(
        final_lin_kernel,
        out_shape=jax.ShapeDtypeStruct((gp, vp), jnp.float32),
        grid=(nb,),
        in_specs=[
            pl.BlockSpec((gp, hc), lambda j: (0, 0)),
            pl.BlockSpec((hc, TN), lambda j: (0, j)),
            pl.BlockSpec((1, TN), lambda j: (0, j)),
        ],
        out_specs=pl.BlockSpec((gp, TN), lambda j: (0, j)),
        compiler_params=pltpu.CompilerParams(
            dimension_semantics=("parallel",)),
    )(x11, w_fin, b_fin)


# =============================== glue (JAX) =================================
def build_dense_graph(x, edge_index, edge_attr, batch, num_graphs, n_pad, g_pad):
    n = x.shape[0]
    x_pad = jnp.zeros((n_pad, x.shape[1]), jnp.float32).at[:n].set(x)

    src, dst = edge_index[0], edge_index[1]
    adj = jnp.zeros((n_pad, n_pad), jnp.float32).at[dst, src].set(1.0)
    e0 = jnp.zeros((n_pad, n_pad), jnp.float32).at[dst, src].set(edge_attr[:, 0])
    e1 = jnp.zeros((n_pad, n_pad), jnp.float32).at[dst, src].set(edge_attr[:, 1])

    # GATv2Conv default: add_self_loops=True, fill_value='mean'
    # -> per-target-node mean of incoming edge_attr (0 for isolated targets)
    deg = jnp.zeros((n_pad,), jnp.float32).at[dst].add(1.0)
    esum = jnp.zeros((n_pad, 2), jnp.float32).at[dst].add(edge_attr)
    emean = esum / jnp.maximum(deg, 1.0)[:, None]
    diag = jnp.arange(n)
    adj = adj.at[diag, diag].set(1.0)
    e0 = e0.at[diag, diag].set(emean[:n, 0])
    e1 = e1.at[diag, diag].set(emean[:n, 1])

    # additive softmax mask (0 on edges, -1e30 elsewhere); no in-kernel where's
    mbias = jnp.where(adj > 0.0, 0.0, MASK_NEG).astype(jnp.bfloat16)

    # global_mean_pool as a [G, N] averaging matrix
    onehot = (batch[None, :] == jnp.arange(num_graphs)[:, None]).astype(jnp.float32)
    counts = jnp.maximum(onehot.sum(axis=1, keepdims=True), 1.0)
    pool = onehot / counts
    pool_pad = jnp.zeros((g_pad, n_pad), jnp.float32).at[:num_graphs, :n].set(pool)

    # big per-edge tensors in bf16 (halved HBM traffic); softmax math is f32
    return x_pad, mbias, e0.astype(jnp.bfloat16), e1.astype(jnp.bfloat16), pool_pad


def _glorot(key, shape):
    fan_in, fan_out = shape
    lim = jnp.sqrt(6.0 / (fan_in + fan_out))
    return jax.random.uniform(key, shape, jnp.float32, -lim, lim)


def init_params(key):
    keys = iter(jax.random.split(key, 5 * N_LAYERS + 2))
    layers = []
    fin = N_FEATURES
    for _ in range(N_LAYERS):
        wl = _glorot(next(keys), (fin, HIDDEN))           # GATv2 lin_l
        wr = _glorot(next(keys), (fin, HIDDEN))           # GATv2 lin_r
        wlin = _glorot(next(keys), (fin, HIDDEN))         # parallel nn.Linear
        layers.append(dict(
            wl=wl,
            bl=jnp.zeros((1, HIDDEN), jnp.float32),
            w_rl=jnp.concatenate([wr, wlin], axis=1),     # fused [lin_r | Linear]
            b_rl=jnp.zeros((1, 2 * HIDDEN), jnp.float32),
            we=_glorot(next(keys), (2, HIDDEN)),          # lin_edge (edge_dim=2)
            att=_glorot(next(keys), (1, HIDDEN)),         # att (heads x C)
            bat=jnp.zeros((1, HIDDEN), jnp.float32),      # GATv2 bias
        ))
        fin = HIDDEN
    v_pad = _round_up(SPEC_VEC_LEN, TN)
    w = _glorot(next(keys), (HIDDEN, SPEC_VEC_LEN))
    w_fin = jnp.zeros((HIDDEN, v_pad), jnp.float32).at[:, :SPEC_VEC_LEN].set(w)
    return dict(layers=layers,
                w_fin=w_fin.astype(jnp.bfloat16),         # HBM-bound final matmul
                b_fin=jnp.zeros((1, v_pad), jnp.float32))


def gcn_forward(params, x, edge_index, edge_attr, batch, num_graphs):
    n = x.shape[0]
    n_pad, tm = _node_tiling(n)
    g_pad = max(8, _round_up(num_graphs, 8))

    x_pad, mbias, e0, e1, pool = build_dense_graph(
        x, edge_index, edge_attr, batch, num_graphs, n_pad, g_pad)

    outs = []
    h = x_pad
    for lp in params["layers"]:
        xlt, xla = lin_l_project(h, lp["wl"], lp["bl"])   # hoisted lin_l (+T)
        h = gat_layer(h, mbias, e0, e1, xlt, xla, lp, tm)
        outs.append(h[:n])                                # x1 .. x10

    x11 = global_mean_pool(h, pool)
    x12 = final_linear(x11, params["w_fin"], params["b_fin"])
    outs.append(x11[:num_graphs])                         # global_mean_pool
    outs.append(x12[:num_graphs, :SPEC_VEC_LEN])          # final Linear
    return outs


# ================================== main ====================================
if __name__ == "__main__":
    key = jax.random.PRNGKey(0)
    k_x, k_s, k_d, k_e = jax.random.split(key, 4)

    N_NODES, N_EDGES, N_GRAPHS = 6, 10, 2
    x = jax.random.normal(k_x, (N_NODES, N_FEATURES), jnp.float32)
    src = jax.random.randint(k_s, (N_EDGES,), 0, N_NODES)
    dst = jax.random.randint(k_d, (N_EDGES,), 0, N_NODES)
    dst = jnp.where(dst == src, (dst + 1) % N_NODES, dst)   # no explicit self loops
    edge_index = jnp.stack([src, dst]).astype(jnp.int32)
    edge_attr = jax.random.normal(k_e, (N_EDGES, 2), jnp.float32)
    batch = jnp.array([0, 0, 0, 1, 1, 1], jnp.int32)

    params = init_params(jax.random.PRNGKey(12345))

    outs = gcn_forward(params, x, edge_index, edge_attr, batch, N_GRAPHS)
    outs = jax.block_until_ready(outs)

    # sanity on shapes implied by the torch forward
    assert outs[0].shape == (N_NODES, HIDDEN)
    assert outs[9].shape == (N_NODES, HIDDEN)
    assert outs[10].shape == (N_GRAPHS, HIDDEN)
    assert outs[11].shape == (N_GRAPHS, SPEC_VEC_LEN)
    assert all(bool(jnp.all(jnp.isfinite(o))) for o in outs)

    print("KERNEL_OK")
</pallas_src>

<mosaic_0001>
module attributes {stable_mosaic.version = 11 : i64} {
  func.func @lin_l_kernel(%arg0: memref<128x16xf32, #tpu.memory_space<vmem>>, %arg1: memref<16x32xf32, #tpu.memory_space<vmem>>, %arg2: memref<1x32xf32, #tpu.memory_space<vmem>>, %arg3: memref<32x128xbf16, #tpu.memory_space<vmem>>, %arg4: memref<128x32xbf16, #tpu.memory_space<vmem>>) attributes {dimension_semantics = [], scalar_prefetch = 0 : i64, scratch_operands = 0 : i64, tpu.core_type = #tpu.core_type<tc>} {
    %c0 = arith.constant 0 : index
    %c0_0 = arith.constant 0 : index
    %0 = vector.load %arg0[%c0, %c0_0] : memref<128x16xf32, #tpu.memory_space<vmem>>, vector<128x16xf32>
    %c0_1 = arith.constant 0 : index
    %c0_2 = arith.constant 0 : index
    %1 = vector.load %arg1[%c0_1, %c0_2] : memref<16x32xf32, #tpu.memory_space<vmem>>, vector<16x32xf32>
    %cst = arith.constant dense<0.000000e+00> : vector<128x32xf32>
    %2 = tpu.matmul %0, %1, %cst {dimension_numbers = #tpu.dot_dimension_numbers<[1], [0], [0], [1], [0, 0, 1, 1], [], []>} : vector<128x16xf32>, vector<16x32xf32>, vector<128x32xf32> -> vector<128x32xf32>
    %c0_3 = arith.constant 0 : index
    %c0_4 = arith.constant 0 : index
    %3 = vector.load %arg2[%c0_3, %c0_4] : memref<1x32xf32, #tpu.memory_space<vmem>>, vector<1x32xf32>
    %4 = vector.broadcast %3 : vector<1x32xf32> to vector<128x32xf32>
    %5 = arith.addf %2, %4 : vector<128x32xf32>
    %6 = tpu.transpose %5, [1, 0] : vector<128x32xf32> -> vector<32x128xf32>
    %7 = arith.truncf %6 : vector<32x128xf32> to vector<32x128xbf16>
    %c0_5 = arith.constant 0 : index
    %c0_6 = arith.constant 0 : index
    %8 = vector.load %arg3[%c0_5, %c0_6] : memref<32x128xbf16, #tpu.memory_space<vmem>>, vector<32x128xbf16>
    tpu.vector_store %arg3[%c0_5, %c0_6], %7 {strides = array<i32>} : memref<32x128xbf16, #tpu.memory_space<vmem>>, vector<32x128xbf16>,
    %9 = arith.truncf %5 : vector<128x32xf32> to vector<128x32xbf16>
    %c0_7 = arith.constant 0 : index
    %c0_8 = arith.constant 0 : index
    %10 = vector.load %arg4[%c0_7, %c0_8] : memref<128x32xbf16, #tpu.memory_space<vmem>>, vector<128x32xbf16>
    tpu.vector_store %arg4[%c0_7, %c0_8], %9 {strides = array<i32>} : memref<128x32xbf16, #tpu.memory_space<vmem>>, vector<128x32xbf16>,
    return
  }
}

</mosaic_0001>

<bundles_post_ra>
// kernel: tpu_custom_call.1
= control target key start
LH: loop header
LB: loop body
LE: loop exit
PB: predicated region body
PF: predicated region fallthrough
CT: control target
= control target key end

     0   :  { %vm42_vm0 = vcmask 130048   ;;  %s723_s0 = inlined_call_operand.vmem [shape: f32[128,16], index: 0, kind: input, shape index: {}]   ;;  %s724_s1 = inlined_call_operand.vmem [shape: f32[16,32], index: 1, kind: input, shape index: {}]   ;;  %s725_s2 = inlined_call_operand.vmem [shape: f32[1,32], index: 2, kind: input, shape index: {}]   ;;  %s726_s3 = inlined_call_operand.hbm [shape: bf16[32,128], index: 3, kind: output, shape index: {0}]   ;;  %s727_s4 = inlined_call_operand.vmem [shape: bf16[128,32], index: 4, kind: output, shape index: {1}]  }
   0x1   :  { %v33_v0 = vld [vmem:[%s724_s1] sm:$0xff]  ;;  %v34_v1 = vld [vmem:[%s724_s1 + $0x8] sm:$0xff]  ;;  %v19_v7 = vld [vmem:[%s723_s0 + $0x10] sm:$0xff] }
   0x2   :  { %v17_v2 = vld [vmem:[%s723_s0] sm:$0xff]  ;;  %v503_v3 = vpack.c.bf16 %v34_v1, %v33_v0  ;;  %v18_v5 = vld [vmem:[%s723_s0 + $0x8] sm:$0xff]  ;;  %v27_v8 = vld [vmem:[%s723_s0 + $0x50] sm:$0xff] }
   0x3   :  { %479 = vmatprep.mubr.msk.f32.mxu0 %vm42_vm0, %v17_v2  ;;  %v25_v4 = vld [vmem:[%s723_s0 + $0x40] sm:$0xff]  ;;  %v26_v6 = vld [vmem:[%s723_s0 + $0x48] sm:$0xff] }
   0x4   :  { %504 = vmatprep.subr.bf16.mxu0 %v503_v3  ;;  %507 = vmatprep.subr.bf16.mxu1 %v503_v3 }
   0x5   :  { %506 = vmatpush3.bf16.msra.mxu0 %v503_v3  ;;  %508 = vmatpush3.bf16.msra.mxu1 %v503_v3 }
   0x6   :  { %491 = vmatprep.mubr.msk.f32.mxu1 %vm42_vm0, %v25_v4 }
   0x7   :  { %10 = vsyncpa [#allocation3], 0  ;;  %v20_v9 = vld [vmem:[%s723_s0 + $0x18] sm:$0xff]  ;;  %v21_v11 = vld [vmem:[%s723_s0 + $0x20] sm:$0xff]  ;;  %vm352_vm1 = vcmask 257024  }
   0x8   :  { %480 = vmatmul.mubr.msk.f32.vlgmr.msra.gmra.mrb[0].mxu0 %vm42_vm0, %v18_v5  ;;  %492 = vmatmul.mubr.msk.f32.vlgmr.msra.gmra.mrb[0].mxu1 %vm42_vm0, %v26_v6  ;;  %v28_v10 = vld [vmem:[%s723_s0 + $0x58] sm:$0xff]  ;;  %v29_v12 = vld [vmem:[%s723_s0 + $0x60] sm:$0xff]  ;;  %v22_v13 = vld [vmem:[%s723_s0 + $0x28] sm:$0xff] }
   0x9   :  { %482 = vmatprep.mubr.msk.f32.mxu0 %vm42_vm0, %v19_v7  ;;  %494 = vmatprep.mubr.msk.f32.mxu1 %vm42_vm0, %v27_v8  ;;  %v30_v14 = vld [vmem:[%s723_s0 + $0x68] sm:$0xff]  ;;  %v23_v15 = vld [vmem:[%s723_s0 + $0x30] sm:$0xff]  ;;  %v24_v17 = vld [vmem:[%s723_s0 + $0x38] sm:$0xff] }
   0xa   :  { %v31_v16 = vld [vmem:[%s723_s0 + $0x70] sm:$0xff]  ;;  %v32_v18 = vld [vmem:[%s723_s0 + $0x78] sm:$0xff]  ;;  %v389_v19 = vld [vmem:[%s725_s2] ss:$0 sm:$0xff] }
   0xc   :  { %483 = vmatmul.mubr.msk.f32.gmra.mrb[2].mxu0 %vm42_vm0, %v20_v9  ;;  %495 = vmatmul.mubr.msk.f32.gmra.mrb[2].mxu1 %vm42_vm0, %v28_v10 }
   0xd   :  { %485 = vmatprep.mubr.msk.f32.mxu0 %vm42_vm0, %v21_v11  ;;  %497 = vmatprep.mubr.msk.f32.mxu1 %vm42_vm0, %v29_v12 }
  0x10   :  { %486 = vmatmul.mubr.msk.f32.gmra.mrb[4].mxu0 %vm42_vm0, %v22_v13  ;;  %498 = vmatmul.mubr.msk.f32.gmra.mrb[4].mxu1 %vm42_vm0, %v30_v14 }
  0x11   :  { %488 = vmatprep.mubr.msk.f32.mxu0 %vm42_vm0, %v23_v15  ;;  %500 = vmatprep.mubr.msk.f32.mxu1 %vm42_vm0, %v31_v16 }
  0x14   :  { %489 = vmatmul.mubr.msk.f32.gmra.mrb[6].mxu0 %vm42_vm0, %v24_v17  ;;  %501 = vmatmul.mubr.msk.f32.gmra.mrb[6].mxu1 %vm42_vm0, %v32_v18 }
  0xdb   :  { %v481_v20 = vpop.f32.mrb[0].mxu0  ;;  %v493_v21 = vpop.f32.mrb[0].mxu1 }
  0xdc   :  { %v163_v22 = vadd.f32 %v481_v20, %v389_v19  ;;  %v157_v23 = vpop.f32.mrb[1].mxu0  ;;  %v637_v24 = vadd.f32 %v493_v21, %v389_v19  ;;  %v197_v25 = vpop.f32.mrb[1].mxu1 }
  0xdd   :  { %v158_v26 = vadd.f32 %v389_v19, %v157_v23  ;;  %v639_v27 = vadd.f32 %v389_v19, %v197_v25 }
  0xde   :  { %v431_v28 = vpack.c.bf16 %v163_v22, %v163_v22  ;;  %v439_v29 = vpack.c.bf16 %v637_v24, %v637_v24 }
  0xdf   :  { %v430_v30 = vpack.c.bf16 %v158_v26, %v158_v26  ;;  %236 = vxpose.xlu0.b32.start [1/16] (narrow) %v158_v26, 32  ;;  %v484_v31 = vpop.f32.mrb[2].mxu0  ;;  %v438_v32 = vpack.c.bf16 %v639_v27, %v639_v27  ;;  %v496_v33 = vpop.f32.mrb[2].mxu1 }
  0xe0   :  { %354 = vst.msk [vmem:[%s727_s4 + $0x4] sm:$0xf] %vm352_vm1, %v431_v28  ;;  %v173_v34 = vadd.f32 %v484_v31, %v389_v19  ;;  %v167_v35 = vpop.f32.mrb[3].mxu0  ;;  %362 = vst.msk [vmem:[%s727_s4 + $0x24] sm:$0xf] %vm352_vm1, %v439_v29  ;;  %v213_v36 = vadd.f32 %v496_v33, %v389_v19  ;;  %v207_v37 = vpop.f32.mrb[3].mxu1 }
  0xe1   :  { %353 = vst.msk [vmem:[%s727_s4] sm:$0xf] %vm352_vm1, %v430_v30  ;;  %v168_v38 = vadd.f32 %v389_v19, %v167_v35  ;;  %361 = vst.msk [vmem:[%s727_s4 + $0x20] sm:$0xf] %vm352_vm1, %v438_v32  ;;  %v208_v39 = vadd.f32 %v389_v19, %v207_v37 }
  0xe2   :  { %v433_v40 = vpack.c.bf16 %v173_v34, %v173_v34  ;;  %v441_v41 = vpack.c.bf16 %v213_v36, %v213_v36 }
  0xe3   :  { %v432_v42 = vpack.c.bf16 %v168_v38, %v168_v38  ;;  %237 = vxpose.xlu0.b32.cont [2/16] (narrow) %v163_v22, 32  ;;  %v487_v43 = vpop.f32.mrb[4].mxu0  ;;  %v440_v44 = vpack.c.bf16 %v208_v39, %v208_v39  ;;  %v499_v45 = vpop.f32.mrb[4].mxu1 }
  0xe4   :  { %356 = vst.msk [vmem:[%s727_s4 + $0xc] sm:$0xf] %vm352_vm1, %v433_v40  ;;  %v183_v46 = vadd.f32 %v487_v43, %v389_v19  ;;  %v177_v47 = vpop.f32.mrb[5].mxu0  ;;  %364 = vst.msk [vmem:[%s727_s4 + $0x2c] sm:$0xf] %vm352_vm1, %v441_v41  ;;  %v223_v48 = vadd.f32 %v499_v45, %v389_v19  ;;  %v217_v49 = vpop.f32.mrb[5].mxu1 }
  0xe5   :  { %355 = vst.msk [vmem:[%s727_s4 + $0x8] sm:$0xf] %vm352_vm1, %v432_v42  ;;  %v178_v50 = vadd.f32 %v389_v19, %v177_v47  ;;  %363 = vst.msk [vmem:[%s727_s4 + $0x28] sm:$0xf] %vm352_vm1, %v440_v44  ;;  %v218_v51 = vadd.f32 %v389_v19, %v217_v49 }
  0xe6   :  { %v435_v52 = vpack.c.bf16 %v183_v46, %v183_v46  ;;  %v443_v53 = vpack.c.bf16 %v223_v48, %v223_v48 }
  0xe7   :  { %238 = vxpose.xlu0.b32.cont [3/16] (narrow) %v168_v38, 32  ;;  %v434_v54 = vpack.c.bf16 %v178_v50, %v178_v50  ;;  %v490_v55 = vpop.f32.mrb[6].mxu0  ;;  %v442_v56 = vpack.c.bf16 %v218_v51, %v218_v51  ;;  %v502_v57 = vpop.f32.mrb[6].mxu1 }
  0xe8   :  { %358 = vst.msk [vmem:[%s727_s4 + $0x14] sm:$0xf] %vm352_vm1, %v435_v52  ;;  %v193_v58 = vadd.f32 %v490_v55, %v389_v19  ;;  %v187_v59 = vpop.f32.mrb[7].mxu0  ;;  %366 = vst.msk [vmem:[%s727_s4 + $0x34] sm:$0xf] %vm352_vm1, %v443_v53  ;;  %v233_v60 = vadd.f32 %v502_v57, %v389_v19  ;;  %v227_v61 = vpop.f32.mrb[7].mxu1 }
  0xe9   :  { %357 = vst.msk [vmem:[%s727_s4 + $0x10] sm:$0xf] %vm352_vm1, %v434_v54  ;;  %v188_v62 = vadd.f32 %v389_v19, %v187_v59  ;;  %365 = vst.msk [vmem:[%s727_s4 + $0x30] sm:$0xf] %vm352_vm1, %v442_v56  ;;  %v228_v63 = vadd.f32 %v389_v19, %v227_v61 }
  0xea   :  { %v437_v0 = vpack.c.bf16 %v193_v58, %v193_v58  ;;  %v445_v1 = vpack.c.bf16 %v233_v60, %v233_v60 }
  0xeb   :  { %239 = vxpose.xlu0.b32.cont [4/16] (narrow) %v173_v34, 32  ;;  %v436_v2 = vpack.c.bf16 %v188_v62, %v188_v62  ;;  %v444_v3 = vpack.c.bf16 %v228_v63, %v228_v63 }
  0xec   :  { %360 = vst.msk [vmem:[%s727_s4 + $0x1c] sm:$0xf] %vm352_vm1, %v437_v0  ;;  %368 = vst.msk [vmem:[%s727_s4 + $0x3c] sm:$0xf] %vm352_vm1, %v445_v1 }
  0xed   :  { %359 = vst.msk [vmem:[%s727_s4 + $0x18] sm:$0xf] %vm352_vm1, %v436_v2  ;;  %367 = vst.msk [vmem:[%s727_s4 + $0x38] sm:$0xf] %vm352_vm1, %v444_v3  ;;  %s536_s4 = smov [#allocation2]  }
  0xee   :  { %s374_s26 = sshll.u32 %s536_s4, 4  ;;  %s375_s26 = int_to_ptr.vmem [resolvable:$true] %s374_s26 }
  0xef   :  { %240 = vxpose.xlu0.b32.cont [5/16] (narrow) %v178_v50, 32  ;;  %s512_s27 = scalar_lea.vmem %s375_s26, 256  ;;  %p517_p1 = scmp.lt.s32.totalorder %s375_s26, %s375_s26 }
  0xf0   :  { %p513_p0 = scmp.ne.s32.totalorder %s375_s26, %s512_s27  ;;  %p518_p2 = scmp.lt.s32.totalorder %s512_s27, %s512_s27 }
  0xf2   :  { %p519_p3 = por %p518_p2, %p517_p1 }
  0xf3   :  { %241 = vxpose.xlu0.b32.cont [6/16] (narrow) %v183_v46, 32 }
  0xf4   :  { %p520_p4 = pnand %p519_p3, %p513_p0 }
  0xf7   :  { %242 = vxpose.xlu0.b32.cont [7/16] (narrow) %v188_v62, 32 }
  0xfb   :  { %243 = vxpose.xlu0.b32.cont [8/16] (narrow) %v193_v58, 32 }
  0xff   :  { %244 = vxpose.xlu0.b32.cont [9/16] (narrow) %v639_v27, 32 }
 0x103   :  { %245 = vxpose.xlu0.b32.cont [10/16] (narrow) %v637_v24, 32 }
 0x107   :  { %246 = vxpose.xlu0.b32.cont [11/16] (narrow) %v208_v39, 32 }
 0x10b   :  { %247 = vxpose.xlu0.b32.cont [12/16] (narrow) %v213_v36, 32 }
 0x10f   :  { %248 = vxpose.xlu0.b32.cont [13/16] (narrow) %v218_v51, 32 }
 0x113   :  { %249 = vxpose.xlu0.b32.cont [14/16] (narrow) %v223_v48, 32 }
 0x117   :  { %250 = vxpose.xlu0.b32.cont [15/16] (narrow) %v228_v63, 32 }
 0x11b   :  { %251 = vxpose.xlu0.b32.end [16/16] (narrow) %v233_v60, 32 }
 0x15f   :  { %v252_v4 = vpop.trf.xlu0 }
 0x163   :  { %v253_v5 = vpop.trf.xlu0 }
 0x164   :  { %v449_v6 = vpack.c.bf16 %v253_v5, %v252_v4 }
 0x166   :  { %450 = vst [vmem:[#allocation2] sm:$0xff] %v449_v6  }
 0x167   :  { %v254_v7 = vpop.trf.xlu0 }
 0x16b   :  { %v255_v8 = vpop.trf.xlu0 }
 0x16c   :  { %v454_v9 = vpack.c.bf16 %v255_v8, %v254_v7 }
 0x16e   :  { %456 = vst [vmem:[#allocation2 + $0x8] sm:$0xff] %v454_v9  }
 0x16f   :  { %523 = shalt.err (!%p520_p4)
}
 0x170   :  { %s524_s30 = scalar_lea.hbm %s726_s3, 256 }
 0x171   :  { %p525_p5 = scmp.ne.s32.totalorder %s726_s3, %s524_s30  ;;  %p528_p6 = scmp.lt.u32.totalorder %s524_s30, %s726_s3 }
 0x173   :  { %p530_p7 = pnand %p528_p6, %p525_p5 }
 0x175   :  { %533 = shalt.err (!%p530_p7)
}
 0x176   :  { %s537_s9 = smov 64   ;;  %s538_s10 = smov 4  }
 0x177   :  { %380 = dma.vmem_to_hbm [thread:$0]  %s375_s26, 256, %s726_s3, [#allocation3], %s537_s9, %s537_s9, %s538_s10  }
 0x178   :  { %534 = dma.done.wait [#allocation3], 256  }
 0x179   :  { %535 = vsyncadd [#allocation3], 4294967040 }
 0x17a   :  { %388 = vsyncpa [#allocation3], 1 }

</bundles_post_ra>
